<compile_context>
chip_gen: v7x
topology: tpu7x:2x2x1
jax: 0.10.0
libtpu: 0.0.40
codegen_flags: <defaults>
</compile_context>

<pallas_src>
import functools

import jax
import jax.numpy as jnp
from jax.experimental import pallas as pl
from jax.experimental.pallas import tpu as pltpu


def _round_up(v, m):
    return ((v + m - 1) // m) * m


def _pick_tile_n(kc_pad, requested):
    """Largest multiple of 128 that divides kc_pad and is <= requested."""
    n_lanes = kc_pad // 128
    best = 1
    cap = max(requested, 128)
    for d in range(1, n_lanes + 1):
        if n_lanes % d == 0 and d * 128 <= cap:
            best = d
    return best * 128


def _upconv_kernel(seed_ref, x_ref, w_ref, b_ref, o_ref, *,
                   apply_dropout, threshold, scale):
    # (TM, C_in) @ (C_in, TN) on the MXU, f32 accumulation.
    y = jnp.dot(x_ref[...], w_ref[...], preferred_element_type=jnp.float32)
    y = y + b_ref[...]

    if apply_dropout:
        tm, tn = o_ref.shape
        i = pl.program_id(0)
        j = pl.program_id(1)
        # Global element coordinates -> stateless counter-based PRNG.
        row = jax.lax.broadcasted_iota(jnp.int32, (tm, tn), 0) + i * tm
        col = jax.lax.broadcasted_iota(jnp.int32, (tm, tn), 1) + j * tn
        h = (row.astype(jnp.uint32) * jnp.uint32(0x9E3779B9)
             + col.astype(jnp.uint32) * jnp.uint32(0x85EBCA6B)
             + seed_ref[0].astype(jnp.uint32) * jnp.uint32(0xC2B2AE35))
        # splitmix32-style finalizer.
        h = (h ^ (h >> 16)) * jnp.uint32(0x7FEB352D)
        h = (h ^ (h >> 15)) * jnp.uint32(0x846CA68B)
        h = h ^ (h >> 16)
        # Integer threshold compare (no u32->f32 conversion needed):
        # keep with prob (1 - p), inverted-dropout scaling 1/(1-p).
        keep = h >= jnp.uint32(threshold)
        y = jnp.where(keep, y * scale, 0.0)

    o_ref[...] = jnp.maximum(y, 0.0).astype(o_ref.dtype)


def upconv_block_forward(x, weight, bias, *, ksize, stride=2, drop_rate=0.2,
                         training=True, seed=0, tile_m=256, tile_n=512,
                         compute_dtype=None):
    """Forward of UpConvBlock.

    x: (N, C_in, H, W). weight: (C_in, C_out, k, k) (torch ConvTranspose2d
    layout). bias: (C_out,). Returns (N, C_out, H*k, W*k) in x.dtype.
    """
    if ksize != stride:
        # TODO(synk): overlapping transposed conv (ksize != stride) needs a
        # scatter-add epilogue; only the canonical UNet case ksize == stride is done.
        raise NotImplementedError("only ksize == stride is supported")

    N, C_in, H, W = x.shape
    k = ksize
    C_out = weight.shape[1]
    P = N * H * W
    KC = C_out * k * k
    out_dtype = x.dtype
    if compute_dtype is None:
        compute_dtype = x.dtype

    # NOTE: if the surrounding model keeps NHWC activations, this transpose (a
    # full extra HBM pass) disappears; we keep NCHW here to match the torch API.
    x_flat = jnp.transpose(x, (0, 2, 3, 1)).reshape(P, C_in).astype(compute_dtype)
    w_flat = weight.reshape(C_in, KC).astype(compute_dtype)   # col = co*k*k + kh*k + kw
    b_flat = jnp.repeat(bias.astype(jnp.float32), k * k).reshape(1, KC)

    # Lane-dense output: pad KC up to a multiple of 128 so stores are unmasked.
    KC_pad = _round_up(KC, 128)
    tile_n_eff = _pick_tile_n(KC_pad, tile_n)
    if KC_pad != KC:
        w_flat = jnp.pad(w_flat, ((0, 0), (0, KC_pad - KC)))
        b_flat = jnp.pad(b_flat, ((0, 0), (0, KC_pad - KC)))

    # M tiling: big slabs (amortize per-step overhead, fill MXU rows), but
    # don't over-pad tiny inputs.
    tile_m_eff = min(tile_m, _round_up(P, 8))
    P_pad = _round_up(P, tile_m_eff)
    if P_pad != P:
        x_flat = jnp.pad(x_flat, ((0, P_pad - P), (0, 0)))

    seed_arr = jnp.array([seed], dtype=jnp.int32)
    apply_dropout = bool(training) and float(drop_rate) > 0.0
    threshold = min((1 << 32) - 1, int(round(float(drop_rate) * (1 << 32))))
    scale = 1.0 / (1.0 - float(drop_rate)) if apply_dropout else 1.0

    kernel = functools.partial(_upconv_kernel,
                               apply_dropout=apply_dropout,
                               threshold=threshold,
                               scale=scale)

    grid = (P_pad // tile_m_eff, KC_pad // tile_n_eff)

    out_flat = pl.pallas_call(
        kernel,
        out_shape=jax.ShapeDtypeStruct((P_pad, KC_pad), out_dtype),
        grid_spec=pltpu.PrefetchScalarGridSpec(
            num_scalar_prefetch=1,
            grid=grid,
            in_specs=[
                pl.BlockSpec((tile_m_eff, C_in), lambda i, j, seed: (i, 0)),
                pl.BlockSpec((C_in, tile_n_eff), lambda i, j, seed: (0, j)),
                pl.BlockSpec((1, tile_n_eff), lambda i, j, seed: (0, j)),
            ],
            out_specs=pl.BlockSpec((tile_m_eff, tile_n_eff),
                                   lambda i, j, seed: (i, j)),
        ),
        # Grid steps are fully independent (stateless per-element dropout hash),
        # so both axes can shard across v7x's two TensorCores.
        compiler_params=pltpu.CompilerParams(
            dimension_semantics=("parallel", "parallel")),
    )(seed_arr, x_flat, w_flat, b_flat)

    out_flat = out_flat[:P, :KC]
    out = out_flat.reshape(N, H, W, C_out, k, k)
    out = jnp.transpose(out, (0, 3, 1, 4, 2, 5)).reshape(N, C_out, H * k, W * k)
    return out


def upconv_block_ref(x, weight, bias, *, ksize, stride, drop_rate=0.2,
                     training=False):
    """Pure-JAX reference (ConvTranspose2d -> [no dropout] -> ReLU)."""
    N, C_in, H, W = x.shape
    C_out = weight.shape[1]
    H_out = (H - 1) * stride + ksize
    W_out = (W - 1) * stride + ksize
    contrib = jnp.einsum("nchw,cokl->nohwkl", x, weight)
    out = jnp.zeros((N, C_out, H_out, W_out), x.dtype)
    for kh in range(ksize):
        for kw in range(ksize):
            out = out.at[:, :,
                         kh:kh + (H - 1) * stride + 1:stride,
                         kw:kw + (W - 1) * stride + 1:stride].add(contrib[..., kh, kw])
    out = out + bias[None, :, None, None]
    return jnp.maximum(out, 0.0)


if __name__ == "__main__":
    key = jax.random.PRNGKey(0)
    k_x, k_w, k_b = jax.random.split(key, 3)

    N, C_in, C_out, H, W = 2, 4, 8, 16, 16
    ksize, stride, drop_rate = 2, 2, 0.2

    x = jax.random.normal(k_x, (N, C_in, H, W), dtype=jnp.float32)
    weight = jax.random.normal(k_w, (C_in, C_out, ksize, ksize), dtype=jnp.float32) * 0.1
    bias = jax.random.normal(k_b, (C_out,), dtype=jnp.float32) * 0.1

    # 1) Correctness check with dropout disabled (deterministic, f32 path).
    y_eval = upconv_block_forward(x, weight, bias, ksize=ksize, stride=stride,
                                  drop_rate=drop_rate, training=False)
    y_ref = upconv_block_ref(x, weight, bias, ksize=ksize, stride=stride)
    jax.block_until_ready(y_eval)
    H_out = (H - 1) * stride + ksize
    W_out = (W - 1) * stride + ksize
    assert y_eval.shape == (N, C_out, H_out, W_out)
    assert jnp.allclose(y_eval, y_ref, atol=1e-4, rtol=1e-4), "mismatch vs reference"

    # 2) Training-mode forward: in-kernel stateless dropout + ReLU, bf16 inputs
    #    to halve HBM read traffic (f32 MXU accumulation, f32 output).
    y_train = upconv_block_forward(x, weight, bias, ksize=ksize, stride=stride,
                                   drop_rate=drop_rate, training=True, seed=1234,
                                   compute_dtype=jnp.bfloat16)
    jax.block_until_ready(y_train)
    assert y_train.shape == y_ref.shape
    assert bool(jnp.all(y_train >= 0.0))
    frac_zero_eval = float(jnp.mean(y_eval == 0.0))
    frac_zero_train = float(jnp.mean(y_train == 0.0))
    assert frac_zero_train > frac_zero_eval, "dropout did not zero anything"

    print("KERNEL_OK")
</pallas_src>

<mosaic_0001>
module attributes {stable_mosaic.version = 11 : i64} {
  func.func @_upconv_kernel(%arg0: i32, %arg1: i32, %arg2: memref<1xi32, #tpu.memory_space<smem>>, %arg3: memref<256x4xf32, #tpu.memory_space<vmem>>, %arg4: memref<4x128xf32, #tpu.memory_space<vmem>>, %arg5: memref<1x128xf32, #tpu.memory_space<vmem>>, %arg6: memref<256x128xf32, #tpu.memory_space<vmem>>) attributes {dimension_semantics = [#tpu.dimension_semantics<parallel>, #tpu.dimension_semantics<parallel>], iteration_bounds = array<i64: 2, 1>, scalar_prefetch = 1 : i64, scratch_operands = 0 : i64, tpu.core_type = #tpu.core_type<tc>, window_params = [{transform_indices = @transform_0, window_bounds = array<i64: 256, 4>}, {transform_indices = @transform_1, window_bounds = array<i64: 4, 128>}, {transform_indices = @transform_2, window_bounds = array<i64: 1, 128>}, {transform_indices = @transform_3, window_bounds = array<i64: 256, 128>}]} {
    %c0 = arith.constant 0 : index
    %c0_0 = arith.constant 0 : index
    %0 = vector.load %arg3[%c0, %c0_0] : memref<256x4xf32, #tpu.memory_space<vmem>>, vector<256x4xf32>
    %c0_1 = arith.constant 0 : index
    %c0_2 = arith.constant 0 : index
    %1 = vector.load %arg4[%c0_1, %c0_2] : memref<4x128xf32, #tpu.memory_space<vmem>>, vector<4x128xf32>
    %cst = arith.constant dense<0.000000e+00> : vector<256x128xf32>
    %2 = tpu.matmul %0, %1, %cst {dimension_numbers = #tpu.dot_dimension_numbers<[1], [0], [0], [1], [0, 0, 1, 1], [], []>} : vector<256x4xf32>, vector<4x128xf32>, vector<256x128xf32> -> vector<256x128xf32>
    %c0_3 = arith.constant 0 : index
    %c0_4 = arith.constant 0 : index
    %3 = vector.load %arg5[%c0_3, %c0_4] : memref<1x128xf32, #tpu.memory_space<vmem>>, vector<1x128xf32>
    %4 = vector.broadcast %3 : vector<1x128xf32> to vector<256x128xf32>
    %5 = arith.addf %2, %4 : vector<256x128xf32>
    %cst_5 = arith.constant 0.000000e+00 : f32
    %6 = vector.broadcast %cst_5 : f32 to vector<256x128xf32>
    %7 = arith.maximumf %5, %6 : vector<256x128xf32>
    %c0_6 = arith.constant 0 : index
    %c0_7 = arith.constant 0 : index
    %8 = vector.load %arg6[%c0_6, %c0_7] : memref<256x128xf32, #tpu.memory_space<vmem>>, vector<256x128xf32>
    tpu.vector_store %arg6[%c0_6, %c0_7], %7 {strides = array<i32>} : memref<256x128xf32, #tpu.memory_space<vmem>>, vector<256x128xf32>,
    return
  }
  func.func @transform_0(%arg0: i32, %arg1: i32, %arg2: memref<1xi32, #tpu.memory_space<smem>>) -> (i32, i32) {
    %c0_i32 = arith.constant 0 : i32
    %c0_i32_0 = arith.constant 0 : i32
    return %arg0, %c0_i32 : i32, i32
  }
  func.func @transform_1(%arg0: i32, %arg1: i32, %arg2: memref<1xi32, #tpu.memory_space<smem>>) -> (i32, i32) {
    %c0_i32 = arith.constant 0 : i32
    %c0_i32_0 = arith.constant 0 : i32
    return %c0_i32, %arg1 : i32, i32
  }
  func.func @transform_2(%arg0: i32, %arg1: i32, %arg2: memref<1xi32, #tpu.memory_space<smem>>) -> (i32, i32) {
    %c0_i32 = arith.constant 0 : i32
    %c0_i32_0 = arith.constant 0 : i32
    return %c0_i32, %arg1 : i32, i32
  }
  func.func @transform_3(%arg0: i32, %arg1: i32, %arg2: memref<1xi32, #tpu.memory_space<smem>>) -> (i32, i32) {
    %c0_i32 = arith.constant 0 : i32
    return %arg0, %arg1 : i32, i32
  }
}

</mosaic_0001>

<bundles_post_ra>
// kernel: tpu_custom_call.1
= control target key start
LH: loop header
LB: loop body
LE: loop exit
PB: predicated region body
PF: predicated region fallthrough
CT: control target
= control target key end

     0   :  { %10 = vsyncpa [#allocation5], 0  ;;  %s1322_s0 = inlined_call_operand.<no memory space> [shape: s32[1], index: 0, kind: input, shape index: {}]   ;;  %s1323_s1 = inlined_call_operand.vmem [shape: f32[512,4], index: 1, kind: input, shape index: {}]   ;;  %s1324_s2 = inlined_call_operand.vmem [shape: f32[4,128], index: 2, kind: input, shape index: {}]   ;;  %s1325_s3 = inlined_call_operand.vmem [shape: f32[1,128], index: 3, kind: input, shape index: {}]   ;;  %s1326_s4 = inlined_call_operand.hbm [shape: f32[512,128], index: 4, kind: output, shape index: {}]  }
   0x1   :  { %12 = vsyncpa [#allocation5 + $0x1], 0  ;;  %s1063_s15 = smov 0   ;;  %s1065_s16 = smov 0  }
   0x2   :  { %s1067_s17 = smov 0   ;;  %s1069_s0 = smov 0  }
   0x3   :  { %s1071_s18 = smov 0   ;;  %s1073_s19 = smov 0  }
   0x4 LB: > { %s763_s20 = sadd.s32 4294967295, %s1033_s19   ;;  %s764_s21 = sadd.s32 4294967294, %s1033_s19   ;;  %s1033_s19 = sphi %s1073_s19, %s18_s19   ;;  %s1029_s18 = sphi %s1071_s18, %s1333_s18   ;;  %s1025_s0 = sphi %s1069_s0, %s1332_s0   ;;  %s1021_s17 = sphi %s1067_s17, %s1331_s17   ;;  %s1017_s16 = sphi %s1065_s16, %s1330_s16   ;;  %s1013_s15 = sphi %s1063_s15, %s1329_s15  }
   0x5   : > { %s30_s22 = sadd.s32 1, %s1029_s18  ;;  %s117_s23 = sadd.s32 1, %s1021_s17 }
   0x6   : > { %p32_p0 = scmp.ge.s32.totalorder %s30_s22, 2  ;;  %p127_p1 = scmp.ne.s32.totalorder %s1021_s17, %s1017_s16 }
   0x7   : > { %p128_p2 = scmp.eq.s32.totalorder %s763_s20, 1  ;;  %p133_p3 = scmp.ne.s32.totalorder %s1017_s16, %s1013_s15 }
   0x8   : > { %s1335_s22 = smov (%p32_p0, %s30_s22), 0  ;;  %p134_p5 = scmp.eq.s32.totalorder %s764_s21, 1 }
   0x9   : > { %p1103_p4 = por %p128_p2, %p127_p1  ;;  %s112_s25 = ssub.s32 %s1029_s18, %s1335_s22 }
   0xa   : > { %p769_p6 = scmp.ge.s32.totalorder %s1033_s19, 1  ;;  %p115_p7 = scmp.eq.s32.totalorder %s112_s25, 0 }
   0xb   : > { %p1110_p8 = por %p134_p5, %p133_p3  ;;  %p174_p9 = scmp.lt.s32.totalorder %s1033_s19, 3 }
   0xc   : > { %s1116_s27 = scalar_select %p115_p7, %s1021_s17, %s117_s23  }
   0xd   : > { %p175_p10 = pnand %p769_p6, %p174_p9 }
   0xe   : > { %v251_v0 = vld [vmem:[%s1324_s2] sm:$0xf] (!%p175_p10)  ;;  %vm356_vm0 = vcmask (!%p175_p10), 1043456   ;;  %s771_s30 = sshll.u32 (!%p175_p10), %s1025_s0, 5  ;;  %vm259_vm1 = vcmask (!%p175_p10), 31744   ;;  %s202_s9 = sand.u32 (!%p175_p10), 1, %s1017_s16  }
   0xf   : > { %178 = sbr.rel (%p175_p10) target bundleno = 288 (0x120), region = 32  ;;  %846 = vmatprep.subr.msk.mxu0 (!%p175_p10), %vm356_vm0, %v251_v0  ;;  %896 = vmatprep.subr.msk.mxu1 (!%p175_p10), %vm356_vm0, %v251_v0  ;;  %p206_p11 = scmp.lt.s32.totalorder (!%p175_p10), %s771_s30, 63  ;;  %v1195_v33 = vld [vmem:[%s1325_s3] ss:$0 sm:$0xff] (!%p175_p10) }
  0x10   : > { %847 = vmatpush3.msk.msra.mxu0 (!%p175_p10), %vm356_vm0, %v251_v0  ;;  %897 = vmatpush3.msk.msra.mxu1 (!%p175_p10), %vm356_vm0, %v251_v0  ;;  %s770_s12 = sshll.u32 (!%p175_p10), %s202_s9, 8  ;;  %s812_s14 = sshll.u32 (!%p175_p10), %s1025_s0, 12 }
  0x11   : > { %s1203_s13 = scalar_lea.vmem (!%p175_p10), [#allocation4], %s770_s12  ;;  %s1266_s23 = scalar_lea.hbm (!%p175_p10), %s1326_s4, %s812_s14 }
  0x12   : > { %s664_s20 = sshll.u32 (!%p175_p10), %s1203_s13, 4  ;;  %s1276_s25 = scalar_lea.sflag (!%p175_p10), [#allocation5], %s202_s9  ;;  %s1268_s20 = int_to_ptr.vmem [resolvable:$true] %s664_s20 }
  0x13   : > { %s955_s28 = scalar_lea.vmem (!%p175_p10), %s1268_s20, 4096  ;;  %s1035_s29 = smov (!%p175_p10), [#allocation4]  }
  0x14   : > { %p956_p12 = scmp.ne.s32.totalorder (!%p175_p10), %s1268_s20, %s955_s28 }
  0x16   : > { %s1337_s30 = smov (!%p206_p11, %s771_s30), 63  ;;  %p957_p13 = pnand %p956_p12, %p1103_p4 }
  0x17   : > { %s772_s5 = sshll.u32 %s1337_s30, 3  ;;  %s959_s30 = sshll.u32 %s1035_s29, 4  ;;  %s960_s30 = int_to_ptr.vmem [resolvable:$false] %s959_s30 }
  0x18   : > { %s1125_s8 = scalar_lea.vmem %s1323_s1, %s772_s5  ;;  %p958_p0 = pneg %p957_p13 }
  0x19   : > { %v219_v1 = vld [vmem:[%s1125_s8] sm:$0xff]  ;;  %v220_v3 = vld [vmem:[%s1125_s8 + $0x8] sm:$0xff]  ;;  %v221_v5 = vld [vmem:[%s1125_s8 + $0x10] sm:$0xff]  ;;  %s961_s5 = scalar_lea.vmem %s960_s30, 8192  ;;  %p962_p1 = scmp.lt.s32.totalorder %s1268_s20, %s960_s30 }
  0x1a   : > { %v235_v2 = vld [vmem:[%s1125_s8 + $0x80] sm:$0xff]  ;;  %848 = vmatprep.mubr.msk.f32.mxu0 %vm259_vm1, %v219_v1  ;;  %v236_v4 = vld [vmem:[%s1125_s8 + $0x88] sm:$0xff]  ;;  %v237_v6 = vld [vmem:[%s1125_s8 + $0x90] sm:$0xff]  ;;  %p963_p2 = scmp.lt.s32.totalorder %s961_s5, %s955_s28 }
  0x1b   : > { %872 = vmatprep.mubr.msk.f32.mxu1 %vm259_vm1, %v235_v2  ;;  %849 = vmatmul.mubr.msk.f32.vlgmr.msra.gmra.mrb[0].mxu0 %vm259_vm1, %v220_v3  ;;  %v222_v7 = vld [vmem:[%s1125_s8 + $0x18] sm:$0xff]  ;;  %v223_v9 = vld [vmem:[%s1125_s8 + $0x20] sm:$0xff]  ;;  %v224_v11 = vld [vmem:[%s1125_s8 + $0x28] sm:$0xff] }
  0x1c   : > { %873 = vmatmul.mubr.msk.f32.vlgmr.msra.gmra.mrb[0].mxu1 %vm259_vm1, %v236_v4  ;;  %851 = vmatprep.mubr.msk.f32.mxu0 %vm259_vm1, %v221_v5  ;;  %v238_v8 = vld [vmem:[%s1125_s8 + $0x98] sm:$0xff]  ;;  %v239_v10 = vld [vmem:[%s1125_s8 + $0xa0] sm:$0xff]  ;;  %v240_v12 = vld [vmem:[%s1125_s8 + $0xa8] sm:$0xff]  ;;  %p964_p3 = por %p963_p2, %p962_p1 }
  0x1d   : > { %875 = vmatprep.mubr.msk.f32.mxu1 %vm259_vm1, %v237_v6  ;;  %v225_v13 = vld [vmem:[%s1125_s8 + $0x30] sm:$0xff]  ;;  %v226_v15 = vld [vmem:[%s1125_s8 + $0x38] sm:$0xff]  ;;  %v227_v17 = vld [vmem:[%s1125_s8 + $0x40] sm:$0xff] }
  0x1e   : > { %v241_v14 = vld [vmem:[%s1125_s8 + $0xb0] sm:$0xff]  ;;  %v242_v16 = vld [vmem:[%s1125_s8 + $0xb8] sm:$0xff]  ;;  %v243_v18 = vld [vmem:[%s1125_s8 + $0xc0] sm:$0xff]  ;;  %p965_p5 = pnand %p964_p3, %p958_p0 }
  0x1f   : > { %852 = vmatmul.mubr.msk.f32.gmra.mrb[2].mxu0 %vm259_vm1, %v222_v7  ;;  %v228_v19 = vld [vmem:[%s1125_s8 + $0x48] sm:$0xff]  ;;  %v229_v21 = vld [vmem:[%s1125_s8 + $0x50] sm:$0xff]  ;;  %v230_v23 = vld [vmem:[%s1125_s8 + $0x58] sm:$0xff] }
  0x20   : > { %876 = vmatmul.mubr.msk.f32.gmra.mrb[2].mxu1 %vm259_vm1, %v238_v8  ;;  %854 = vmatprep.mubr.msk.f32.mxu0 %vm259_vm1, %v223_v9  ;;  %v244_v20 = vld [vmem:[%s1125_s8 + $0xc8] sm:$0xff]  ;;  %v245_v22 = vld [vmem:[%s1125_s8 + $0xd0] sm:$0xff]  ;;  %v246_v24 = vld [vmem:[%s1125_s8 + $0xd8] sm:$0xff] }
  0x21   : > { %878 = vmatprep.mubr.msk.f32.mxu1 %vm259_vm1, %v239_v10  ;;  %v231_v25 = vld [vmem:[%s1125_s8 + $0x60] sm:$0xff]  ;;  %v232_v27 = vld [vmem:[%s1125_s8 + $0x68] sm:$0xff]  ;;  %v233_v29 = vld [vmem:[%s1125_s8 + $0x70] sm:$0xff] }
  0x22   : > { %v247_v26 = vld [vmem:[%s1125_s8 + $0xe0] sm:$0xff]  ;;  %v248_v28 = vld [vmem:[%s1125_s8 + $0xe8] sm:$0xff]  ;;  %v249_v30 = vld [vmem:[%s1125_s8 + $0xf0] sm:$0xff] }
  0x23   : > { %855 = vmatmul.mubr.msk.f32.gmra.mrb[4].mxu0 %vm259_vm1, %v224_v11  ;;  %v234_v31 = vld [vmem:[%s1125_s8 + $0x78] sm:$0xff] }
  0x24   : > { %879 = vmatmul.mubr.msk.f32.gmra.mrb[4].mxu1 %vm259_vm1, %v240_v12  ;;  %857 = vmatprep.mubr.msk.f32.mxu0 %vm259_vm1, %v225_v13  ;;  %v250_v32 = vld [vmem:[%s1125_s8 + $0xf8] sm:$0xff] }
  0x25   : > { %881 = vmatprep.mubr.msk.f32.mxu1 %vm259_vm1, %v241_v14 }
  0x27   : > { %858 = vmatmul.mubr.msk.f32.gmra.mrb[6].mxu0 %vm259_vm1, %v226_v15 }
  0x28   : > { %882 = vmatmul.mubr.msk.f32.gmra.mrb[6].mxu1 %vm259_vm1, %v242_v16  ;;  %860 = vmatprep.mubr.msk.f32.mxu0 %vm259_vm1, %v227_v17 }
  0x29   : > { %884 = vmatprep.mubr.msk.f32.mxu1 %vm259_vm1, %v243_v18 }
  0x2b   : > { %861 = vmatmul.mubr.msk.f32.gmra.mrb[8].mxu0 %vm259_vm1, %v228_v19 }
  0x2c   : > { %885 = vmatmul.mubr.msk.f32.gmra.mrb[8].mxu1 %vm259_vm1, %v244_v20  ;;  %863 = vmatprep.mubr.msk.f32.mxu0 %vm259_vm1, %v229_v21 }
  0x2d   : > { %887 = vmatprep.mubr.msk.f32.mxu1 %vm259_vm1, %v245_v22 }
  0x2f   : > { %864 = vmatmul.mubr.msk.f32.gmra.mrb[10].mxu0 %vm259_vm1, %v230_v23 }
  0x30   : > { %888 = vmatmul.mubr.msk.f32.gmra.mrb[10].mxu1 %vm259_vm1, %v246_v24  ;;  %866 = vmatprep.mubr.msk.f32.mxu0 %vm259_vm1, %v231_v25 }
  0x31   : > { %890 = vmatprep.mubr.msk.f32.mxu1 %vm259_vm1, %v247_v26 }
  0x33   : > { %867 = vmatmul.mubr.msk.f32.gmra.mrb[12].mxu0 %vm259_vm1, %v232_v27 }
  0x34   : > { %891 = vmatmul.mubr.msk.f32.gmra.mrb[12].mxu1 %vm259_vm1, %v248_v28  ;;  %869 = vmatprep.mubr.msk.f32.mxu0 %vm259_vm1, %v233_v29 }
  0x35   : > { %893 = vmatprep.mubr.msk.f32.mxu1 %vm259_vm1, %v249_v30 }
  0x37   : > { %870 = vmatmul.mubr.msk.f32.gmra.mrb[14].mxu0 %vm259_vm1, %v234_v31 }
  0x38   : > { %894 = vmatmul.mubr.msk.f32.gmra.mrb[14].mxu1 %vm259_vm1, %v250_v32 }
  0xee   : > { %v850_v34 = vpop.f32.mrb[0].mxu0 }
  0xef   : > { %v874_v35 = vpop.f32.mrb[0].mxu1  ;;  %v432_v36 = vadd.f32 %v850_v34, %v1195_v33  ;;  %v426_v38 = vpop.f32.mrb[1].mxu0 }
  0xf0   : > { %v512_v37 = vadd.f32 %v874_v35, %v1195_v33  ;;  %v506_v39 = vpop.f32.mrb[1].mxu1  ;;  %v427_v40 = vadd.f32 %v1195_v33, %v426_v38 }
  0xf1   : > { %v507_v41 = vadd.f32 %v1195_v33, %v506_v39  ;;  %v586_v42 = vmax.f32 %v432_v36, 0.0 }
  0xf2   : > { %v602_v43 = vmax.f32 %v512_v37, 0.0  ;;  %v585_v44 = vmax.f32 %v427_v40, 0.0  ;;  %v853_v46 = vpop.f32.mrb[2].mxu0 }
  0xf3   : > { %v601_v45 = vmax.f32 %v507_v41, 0.0  ;;  %v877_v47 = vpop.f32.mrb[2].mxu1  ;;  %618 = vst [vmem:[%s1203_s13 + $0x8] sm:$0xff] %v586_v42  ;;  %v442_v48 = vadd.f32 %v853_v46, %v1195_v33  ;;  %v436_v50 = vpop.f32.mrb[3].mxu0 }
  0xf4   : > { %634 = vst [vmem:[%s1203_s13 + $0x88] sm:$0xff] %v602_v43  ;;  %v522_v49 = vadd.f32 %v877_v47, %v1195_v33  ;;  %v516_v51 = vpop.f32.mrb[3].mxu1  ;;  %617 = vst [vmem:[%s1203_s13] sm:$0xff] %v585_v44  ;;  %v437_v52 = vadd.f32 %v1195_v33, %v436_v50 }
  0xf5   : > { %633 = vst [vmem:[%s1203_s13 + $0x80] sm:$0xff] %v601_v45  ;;  %v517_v53 = vadd.f32 %v1195_v33, %v516_v51  ;;  %v588_v54 = vmax.f32 %v442_v48, 0.0 }
  0xf6   : > { %v604_v55 = vmax.f32 %v522_v49, 0.0  ;;  %v587_v56 = vmax.f32 %v437_v52, 0.0  ;;  %v856_v58 = vpop.f32.mrb[4].mxu0 }
  0xf7   : > { %v603_v57 = vmax.f32 %v517_v53, 0.0  ;;  %v880_v59 = vpop.f32.mrb[4].mxu1  ;;  %620 = vst [vmem:[%s1203_s13 + $0x18] sm:$0xff] %v588_v54  ;;  %v452_v60 = vadd.f32 %v856_v58, %v1195_v33  ;;  %v446_v62 = vpop.f32.mrb[5].mxu0 }
  0xf8   : > { %636 = vst [vmem:[%s1203_s13 + $0x98] sm:$0xff] %v604_v55  ;;  %v532_v61 = vadd.f32 %v880_v59, %v1195_v33  ;;  %v526_v63 = vpop.f32.mrb[5].mxu1  ;;  %619 = vst [vmem:[%s1203_s13 + $0x10] sm:$0xff] %v587_v56  ;;  %v447_v0 = vadd.f32 %v1195_v33, %v446_v62 }
  0xf9   : > { %635 = vst [vmem:[%s1203_s13 + $0x90] sm:$0xff] %v603_v57  ;;  %v527_v1 = vadd.f32 %v1195_v33, %v526_v63  ;;  %v590_v2 = vmax.f32 %v452_v60, 0.0 }
  0xfa   : > { %v606_v3 = vmax.f32 %v532_v61, 0.0  ;;  %v589_v4 = vmax.f32 %v447_v0, 0.0  ;;  %v859_v6 = vpop.f32.mrb[6].mxu0 }
  0xfb   : > { %v605_v5 = vmax.f32 %v527_v1, 0.0  ;;  %v883_v7 = vpop.f32.mrb[6].mxu1  ;;  %622 = vst [vmem:[%s1203_s13 + $0x28] sm:$0xff] %v590_v2  ;;  %v462_v8 = vadd.f32 %v859_v6, %v1195_v33  ;;  %v456_v10 = vpop.f32.mrb[7].mxu0 }
  0xfc   : > { %638 = vst [vmem:[%s1203_s13 + $0xa8] sm:$0xff] %v606_v3  ;;  %v542_v9 = vadd.f32 %v883_v7, %v1195_v33  ;;  %v536_v11 = vpop.f32.mrb[7].mxu1  ;;  %621 = vst [vmem:[%s1203_s13 + $0x20] sm:$0xff] %v589_v4  ;;  %v457_v12 = vadd.f32 %v1195_v33, %v456_v10 }
  0xfd   : > { %637 = vst [vmem:[%s1203_s13 + $0xa0] sm:$0xff] %v605_v5  ;;  %v537_v13 = vadd.f32 %v1195_v33, %v536_v11  ;;  %v592_v14 = vmax.f32 %v462_v8, 0.0 }
  0xfe   : > { %v608_v15 = vmax.f32 %v542_v9, 0.0  ;;  %v591_v16 = vmax.f32 %v457_v12, 0.0  ;;  %v862_v18 = vpop.f32.mrb[8].mxu0 }
  0xff   : > { %v607_v17 = vmax.f32 %v537_v13, 0.0  ;;  %v886_v19 = vpop.f32.mrb[8].mxu1  ;;  %624 = vst [vmem:[%s1203_s13 + $0x38] sm:$0xff] %v592_v14  ;;  %v472_v20 = vadd.f32 %v862_v18, %v1195_v33  ;;  %v466_v22 = vpop.f32.mrb[9].mxu0 }
 0x100   : > { %640 = vst [vmem:[%s1203_s13 + $0xb8] sm:$0xff] %v608_v15  ;;  %v552_v21 = vadd.f32 %v886_v19, %v1195_v33  ;;  %v546_v23 = vpop.f32.mrb[9].mxu1  ;;  %623 = vst [vmem:[%s1203_s13 + $0x30] sm:$0xff] %v591_v16  ;;  %v467_v24 = vadd.f32 %v1195_v33, %v466_v22 }
 0x101   : > { %639 = vst [vmem:[%s1203_s13 + $0xb0] sm:$0xff] %v607_v17  ;;  %v547_v25 = vadd.f32 %v1195_v33, %v546_v23  ;;  %v594_v26 = vmax.f32 %v472_v20, 0.0 }
 0x102   : > { %v610_v27 = vmax.f32 %v552_v21, 0.0  ;;  %v593_v28 = vmax.f32 %v467_v24, 0.0  ;;  %v865_v30 = vpop.f32.mrb[10].mxu0 }
 0x103   : > { %v609_v29 = vmax.f32 %v547_v25, 0.0  ;;  %v889_v31 = vpop.f32.mrb[10].mxu1  ;;  %626 = vst [vmem:[%s1203_s13 + $0x48] sm:$0xff] %v594_v26  ;;  %v482_v32 = vadd.f32 %v865_v30, %v1195_v33  ;;  %v476_v35 = vpop.f32.mrb[11].mxu0 }
 0x104   : > { %642 = vst [vmem:[%s1203_s13 + $0xc8] sm:$0xff] %v610_v27  ;;  %v562_v34 = vadd.f32 %v889_v31, %v1195_v33  ;;  %v556_v36 = vpop.f32.mrb[11].mxu1  ;;  %625 = vst [vmem:[%s1203_s13 + $0x40] sm:$0xff] %v593_v28  ;;  %v477_v37 = vadd.f32 %v1195_v33, %v476_v35 }
 0x105   : > { %641 = vst [vmem:[%s1203_s13 + $0xc0] sm:$0xff] %v609_v29  ;;  %v557_v38 = vadd.f32 %v1195_v33, %v556_v36  ;;  %v596_v39 = vmax.f32 %v482_v32, 0.0 }
 0x106   : > { %v612_v40 = vmax.f32 %v562_v34, 0.0  ;;  %v595_v41 = vmax.f32 %v477_v37, 0.0  ;;  %v868_v43 = vpop.f32.mrb[12].mxu0 }
 0x107   : > { %v611_v42 = vmax.f32 %v557_v38, 0.0  ;;  %v892_v44 = vpop.f32.mrb[12].mxu1  ;;  %628 = vst [vmem:[%s1203_s13 + $0x58] sm:$0xff] %v596_v39  ;;  %v492_v45 = vadd.f32 %v868_v43, %v1195_v33  ;;  %v486_v47 = vpop.f32.mrb[13].mxu0 }
 0x108   : > { %644 = vst [vmem:[%s1203_s13 + $0xd8] sm:$0xff] %v612_v40  ;;  %v572_v46 = vadd.f32 %v892_v44, %v1195_v33  ;;  %v566_v48 = vpop.f32.mrb[13].mxu1  ;;  %627 = vst [vmem:[%s1203_s13 + $0x50] sm:$0xff] %v595_v41  ;;  %v487_v49 = vadd.f32 %v1195_v33, %v486_v47 }
 0x109   : > { %643 = vst [vmem:[%s1203_s13 + $0xd0] sm:$0xff] %v611_v42  ;;  %v567_v50 = vadd.f32 %v1195_v33, %v566_v48  ;;  %v598_v51 = vmax.f32 %v492_v45, 0.0 }
 0x10a   : > { %v614_v52 = vmax.f32 %v572_v46, 0.0  ;;  %v597_v53 = vmax.f32 %v487_v49, 0.0  ;;  %v871_v55 = vpop.f32.mrb[14].mxu0 }
 0x10b   : > { %v613_v54 = vmax.f32 %v567_v50, 0.0  ;;  %v895_v56 = vpop.f32.mrb[14].mxu1  ;;  %630 = vst [vmem:[%s1203_s13 + $0x68] sm:$0xff] %v598_v51  ;;  %v502_v57 = vadd.f32 %v871_v55, %v1195_v33  ;;  %v496_v59 = vpop.f32.mrb[15].mxu0 }
 0x10c   : > { %646 = vst [vmem:[%s1203_s13 + $0xe8] sm:$0xff] %v614_v52  ;;  %v582_v58 = vadd.f32 %v895_v56, %v1195_v33  ;;  %v576_v60 = vpop.f32.mrb[15].mxu1  ;;  %629 = vst [vmem:[%s1203_s13 + $0x60] sm:$0xff] %v597_v53  ;;  %v497_v61 = vadd.f32 %v1195_v33, %v496_v59 }
 0x10d   : > { %645 = vst [vmem:[%s1203_s13 + $0xe0] sm:$0xff] %v613_v54  ;;  %v577_v62 = vadd.f32 %v1195_v33, %v576_v60  ;;  %v600_v63 = vmax.f32 %v502_v57, 0.0 }
 0x10e   : > { %v616_v0 = vmax.f32 %v582_v58, 0.0  ;;  %v599_v1 = vmax.f32 %v497_v61, 0.0 }
 0x10f   : > { %v615_v2 = vmax.f32 %v577_v62, 0.0  ;;  %632 = vst [vmem:[%s1203_s13 + $0x78] sm:$0xff] %v600_v63 }
 0x110   : > { %648 = vst [vmem:[%s1203_s13 + $0xf8] sm:$0xff] %v616_v0  ;;  %631 = vst [vmem:[%s1203_s13 + $0x70] sm:$0xff] %v599_v1 }
 0x111   : > { %647 = vst [vmem:[%s1203_s13 + $0xf0] sm:$0xff] %v615_v2 }
 0x112   : > { %968 = shalt.err (!%p965_p5)
}
 0x113   : > { %s969_s6 = scalar_lea.hbm %s1266_s23, 4096  ;;  %s973_s9 = scalar_lea.hbm %s1326_s4, 8192 }
 0x114   : > { %p970_p6 = scmp.ne.s32.totalorder %s1266_s23, %s969_s6  ;;  %p974_p10 = scmp.lt.u32.totalorder %s1266_s23, %s1326_s4 }
 0x115   : > { %p975_p11 = scmp.lt.u32.totalorder %s973_s9, %s969_s6  ;;  %p977_p13 = scmp.lt.u32.totalorder %s969_s6, %s1266_s23 }
 0x116   : > { %p971_p7 = pnand %p970_p6, %p1103_p4 }
 0x117   : > { %p976_p12 = por %p975_p11, %p974_p10 }
 0x118   : > { %p972_p9 = pneg %p971_p7 }
 0x119   : > { %p978_p0 = por %p977_p13, %p976_p12 }
 0x11b   : > { %p979_p1 = pnand %p978_p0, %p972_p9 }
 0x11d   : > { %982 = shalt.err (!%p979_p1)
}
 0x11e   : > { %s1036_s12 = smov 128   ;;  %s1037_s13 = smov 8  }
 0x11f   : > { %898 = dma.vmem_to_hbm [thread:$0]  (%p1103_p4), %s1268_s20, 4096, %s1266_s23, %s1276_s25, %s1036_s12, %s1036_s12, %s1037_s13  }
 0x120 PF: > { %p904_p2 = scmp.ge.s32.totalorder %s1033_s19, 2  ;;  %s679_s14 = sand.u32 1, %s1013_s15  }
 0x121   : > { %s680_s0 = scalar_lea.sflag [#allocation5], %s679_s14 }
 0x122   : > { %p901_p3 = pnand %p904_p2, %p1110_p8 }
 0x124   : > { %1008 = dma.done.wait (!%p901_p3), %s680_s0, 4096  }
 0x125   : > { %1010 = vsyncadd (!%p901_p3), %s680_s0, 4294963200  ;;  %s18_s19 = sadd.s32 1, %s1033_s19   ;;  %s1329_s15 = smov %s1017_s16 }
 0x126   : > { %p15_p5 = scmp.ge.s32.totalorder %s18_s19, 4   ;;  %s1330_s16 = smov %s1021_s17 }
 0x127   : > { %s1331_s17 = smov %s1116_s27  ;;  %s1332_s0 = smov %s1029_s18 }
 0x128   : > { %s1333_s18 = smov %s1335_s22  ;;  %17 = sbr.rel (!%p15_p5) target bundleno = 4 (0x4), region = 73 }
 0x12f   :  { %685 = vsyncpa [#allocation5], 1 }
 0x130   :  { %687 = vsyncpa [#allocation5 + $0x1], 1 }

</bundles_post_ra>
